<compile_context>
chip_gen: v5e
topology: v5e:2x2
jax: 0.10.0
libtpu: 0.0.40
codegen_flags: <defaults>
</compile_context>

<pallas_src>
import jax
import jax.numpy as jnp
from jax.experimental import pallas as pl
from jax.experimental.pallas import tpu as pltpu

EPS = 1e-5  # nn.InstanceNorm2d default eps


# ---------------------------------------------------------------------------
# VMEM budgeting (generation-aware)
# ---------------------------------------------------------------------------
def _vmem_budgets():
    """Return (vmem_limit_bytes, per_step_budget_bytes) for this chip."""
    cap = 64 << 20  # conservative fallback (v7x-sized VMEM per TensorCore)
    try:
        info = pltpu.get_tpu_info()
        cap = int(getattr(info, "vmem_capacity_bytes", cap))
    except Exception:
        pass
    # ~cap - 16 MiB headroom, but never more than 80% of physical:
    #   128 MiB (v5e/v6e) -> ~102 MiB limit / ~66 MiB step budget
    #    64 MiB (v7x)     ->  ~48 MiB limit / ~31 MiB step budget
    limit = min(cap - (16 << 20), int(cap * 0.8))
    limit = max(limit, 32 << 20)
    step = int(limit * 0.65)
    return limit, step


def _step_vmem_bytes(f_l, f_g, f_int, cols, act_bytes):
    """Honest per-grid-step working-set estimate for `cols` HW lanes."""
    io = 2 * (2 * f_l + f_g) * cols * act_bytes           # x, g, out double-buffered
    wts = 2 * (f_int * (f_g + f_l) + f_int + 1) * 4       # weight blocks (dbl-buffered)
    tmp = (4 * f_int + 2) * cols * 4                       # g1/x1/a/centered f32 + psi rows
    scratch = 2 << 20                                      # compiler internal scratch
    return io + wts + tmp + scratch


def _pick_tile_hw(hw, f_l, f_g, f_int, act_bytes, step_budget):
    """None -> whole-HW fused kernel; else an HW tile (multiple of 128)."""
    if _step_vmem_bytes(f_l, f_g, f_int, hw, act_bytes) <= step_budget:
        return None
    # Prefer large, DMA-friendly tiles: multiples of 512 first, then 256, 128.
    for quant in (512, 256, 128):
        best = None
        for cand in range(quant, hw, quant):
            if hw % cand == 0 and _step_vmem_bytes(
                    f_l, f_g, f_int, cand, act_bytes) <= step_budget:
                best = cand
        if best is not None:
            return best
    # TODO(synk): HW with no fitting 128-multiple divisor needs ragged masked
    # tiles; fall back to the fused whole-HW kernel (may exceed the VMEM limit
    # for very large HW).
    return None


# ---------------------------------------------------------------------------
# Kernels
# ---------------------------------------------------------------------------
def _inorm_lanes(v):
    """InstanceNorm (affine=False) of a (C, HW) tile over the lane (HW) axis."""
    mean = jnp.mean(v, axis=-1, keepdims=True)
    c = v - mean
    var = jnp.mean(c * c, axis=-1, keepdims=True)  # biased variance
    return c * jax.lax.rsqrt(var + EPS)


def _fused_kernel(x_ref, g_ref, wg_ref, wx_ref, wpsi_ref, bpsi_ref, out_ref):
    """Whole-HW-per-sample path. Blocks: x (1,F_l,HW), g (1,F_g,HW)."""
    # 1x1 convs == channel matmuls on the MXU (f32 accumulation).
    g1 = jnp.dot(wg_ref[...], g_ref[0], preferred_element_type=jnp.float32)
    x1 = jnp.dot(wx_ref[...], x_ref[0], preferred_element_type=jnp.float32)

    # b_g / b_x omitted on purpose: cancelled exactly by InstanceNorm's mean
    # subtraction (affine=False).
    a = jnp.maximum(_inorm_lanes(g1) + _inorm_lanes(x1), 0.0)   # (F_int, HW)

    # psi: 1-channel 1x1 conv == per-position weighted sum over F_int
    # (VPU multiply + sublane/XLU reduce; MXU would be a 1-column matmul).
    psi_logit = jnp.sum(a * wpsi_ref[...].astype(jnp.float32),
                        axis=0, keepdims=True) + bpsi_ref[...]   # (1, HW)
    psi = jax.nn.sigmoid(psi_logit)

    # Gate in the activation dtype; only the (1, HW) psi row is cast.
    out_ref[0] = x_ref[0] * psi.astype(out_ref.dtype)


def _make_tiled_kernel(hw):
    """Single-call tiled path: grid=(N, 2, T); p==0 stats, p==1 apply."""
    inv_hw = 1.0 / float(hw)

    def kernel(x_ref, g_ref, wg_ref, wx_ref, wpsi_ref, bpsi_ref,
               out_ref, stats_ref):
        p = pl.program_id(1)
        t = pl.program_id(2)

        @pl.when(jnp.logical_and(p == 0, t == 0))
        def _():
            stats_ref[...] = jnp.zeros_like(stats_ref)

        # Needed by both passes.
        g1 = jnp.dot(wg_ref[...], g_ref[0], preferred_element_type=jnp.float32)
        x1 = jnp.dot(wx_ref[...], x_ref[0], preferred_element_type=jnp.float32)

        @pl.when(p == 0)
        def _():
            # Per-channel sum / sum-of-squares over this HW tile.
            stats_ref[0] += jnp.sum(g1, axis=-1, keepdims=True)       # (F_int, 1)
            stats_ref[1] += jnp.sum(g1 * g1, axis=-1, keepdims=True)
            stats_ref[2] += jnp.sum(x1, axis=-1, keepdims=True)
            stats_ref[3] += jnp.sum(x1 * x1, axis=-1, keepdims=True)

        @pl.when(p == 1)
        def _():
            mean_g = stats_ref[0] * inv_hw
            var_g = jnp.maximum(stats_ref[1] * inv_hw - mean_g * mean_g, 0.0)
            mean_x = stats_ref[2] * inv_hw
            var_x = jnp.maximum(stats_ref[3] * inv_hw - mean_x * mean_x, 0.0)
            rstd_g = jax.lax.rsqrt(var_g + EPS)
            rstd_x = jax.lax.rsqrt(var_x + EPS)

            a = jnp.maximum((g1 - mean_g) * rstd_g + (x1 - mean_x) * rstd_x, 0.0)
            psi_logit = jnp.sum(a * wpsi_ref[...].astype(jnp.float32),
                                axis=0, keepdims=True) + bpsi_ref[...]
            psi = jax.nn.sigmoid(psi_logit)                            # (1, tile)
            out_ref[0] = x_ref[0] * psi.astype(out_ref.dtype)

    return kernel


# ---------------------------------------------------------------------------
# pallas_call wrappers
# ---------------------------------------------------------------------------
def _fused_call(x, g, wg, wx, wpsi, bpsi, vmem_limit):
    N, F_l, HW = x.shape
    _, F_g, _ = g.shape
    F_int = wg.shape[0]
    return pl.pallas_call(
        _fused_kernel,
        out_shape=jax.ShapeDtypeStruct((N, F_l, HW), x.dtype),
        grid_spec=pltpu.PrefetchScalarGridSpec(
            num_scalar_prefetch=0,
            grid=(N,),
            in_specs=[
                pl.BlockSpec((1, F_l, HW), lambda n: (n, 0, 0)),   # x
                pl.BlockSpec((1, F_g, HW), lambda n: (n, 0, 0)),   # g
                pl.BlockSpec((F_int, F_g), lambda n: (0, 0)),      # W_g
                pl.BlockSpec((F_int, F_l), lambda n: (0, 0)),      # W_x
                pl.BlockSpec((F_int, 1), lambda n: (0, 0)),        # W_psi
                pl.BlockSpec((1, 1), lambda n: (0, 0)),            # b_psi
            ],
            out_specs=pl.BlockSpec((1, F_l, HW), lambda n: (n, 0, 0)),
        ),
        compiler_params=pltpu.CompilerParams(
            dimension_semantics=("parallel",),
            vmem_limit_bytes=vmem_limit),
    )(x, g, wg, wx, wpsi, bpsi)


def _tiled_call(x, g, wg, wx, wpsi, bpsi, tile_hw, vmem_limit):
    N, F_l, HW = x.shape
    _, F_g, _ = g.shape
    F_int = wg.shape[0]
    assert HW % tile_hw == 0 and tile_hw % 128 == 0, (HW, tile_hw)
    T = HW // tile_hw

    # x/g tiles are (inherently) read twice: once for full-image stats, once
    # for normalize+gate.  Output block index is held at (n,0,0) during the
    # stats pass (t*p == 0) so no spurious writebacks happen.
    act_spec = lambda shape: pl.BlockSpec(shape, lambda n, p, t: (n, 0, t))
    wgt_spec = lambda shape: pl.BlockSpec(shape, lambda n, p, t: (0, 0))

    return pl.pallas_call(
        _make_tiled_kernel(HW),
        out_shape=jax.ShapeDtypeStruct((N, F_l, HW), x.dtype),
        grid_spec=pltpu.PrefetchScalarGridSpec(
            num_scalar_prefetch=0,
            grid=(N, 2, T),
            in_specs=[
                act_spec((1, F_l, tile_hw)),       # x
                act_spec((1, F_g, tile_hw)),       # g
                wgt_spec((F_int, F_g)),            # W_g
                wgt_spec((F_int, F_l)),            # W_x
                wgt_spec((F_int, 1)),              # W_psi
                wgt_spec((1, 1)),                  # b_psi
            ],
            out_specs=pl.BlockSpec((1, F_l, tile_hw),
                                   lambda n, p, t: (n, 0, t * p)),
            scratch_shapes=[pltpu.VMEM((4, F_int, 1), jnp.float32)],
        ),
        compiler_params=pltpu.CompilerParams(
            dimension_semantics=("parallel", "arbitrary", "arbitrary"),
            vmem_limit_bytes=vmem_limit),
    )(x, g, wg, wx, wpsi, bpsi)


def attention_block(x_nchw, g_nchw, params, *, tile_hw="auto"):
    """x: (N, F_l, H, W), g: (N, F_g, H, W) -> (N, F_l, H, W)."""
    N, F_l, H, W = x_nchw.shape
    _, F_g, _, _ = g_nchw.shape
    HW = H * W
    F_int = params["wg"].shape[0]

    # Free views of NCHW as (N, C, H*W) -- no transpose, no extra HBM pass.
    x = x_nchw.reshape(N, F_l, HW)
    g = g_nchw.reshape(N, F_g, HW)

    # PyTorch (Cout, Cin[,1,1]) layout; cast the matmul weights to the
    # activation dtype so the MXU sees a single dtype (bf16 stays bf16).
    wg = params["wg"].reshape(F_int, F_g).astype(x.dtype)
    wx = params["wx"].reshape(F_int, F_l).astype(x.dtype)
    wpsi = params["wpsi"].reshape(F_int, 1).astype(jnp.float32)
    bpsi = params["bpsi"].reshape(1, 1).astype(jnp.float32)
    # params["bg"], params["bx"] are intentionally unused: a per-channel
    # constant before InstanceNorm(affine=False) is cancelled exactly by the
    # mean subtraction, so dropping them (and their DMAs) is a no-op.

    vmem_limit, step_budget = _vmem_budgets()
    if tile_hw == "auto":
        tile_hw = _pick_tile_hw(HW, F_l, F_g, F_int, x.dtype.itemsize,
                                step_budget)

    if tile_hw is None:
        out = _fused_call(x, g, wg, wx, wpsi, bpsi, vmem_limit)
    else:
        out = _tiled_call(x, g, wg, wx, wpsi, bpsi, int(tile_hw), vmem_limit)
    return out.reshape(N, F_l, H, W)


# ---------------------------------------------------------------------------
# Pure-JAX reference (identical semantics to the PyTorch module, WITH biases)
# ---------------------------------------------------------------------------
def attention_block_ref(x, g, p):
    def conv1x1(v, w, b):                       # v: (N,C,H,W), w: (O,C)
        y = jnp.einsum("nchw,oc->nohw", v, w)
        return y + b.reshape(1, -1, 1, 1)

    def inorm(v):
        mean = jnp.mean(v, axis=(2, 3), keepdims=True)
        var = jnp.mean((v - mean) ** 2, axis=(2, 3), keepdims=True)
        return (v - mean) * jax.lax.rsqrt(var + EPS)

    g1 = inorm(conv1x1(g, p["wg"], p["bg"]))
    x1 = inorm(conv1x1(x, p["wx"], p["bx"]))
    a = jnp.maximum(g1 + x1, 0.0)
    psi = jax.nn.sigmoid(conv1x1(a, p["wpsi"].reshape(1, -1), p["bpsi"]))
    return x * psi


if __name__ == "__main__":
    key = jax.random.PRNGKey(0)
    keys = jax.random.split(key, 12)

    N, F_g, F_l, F_int, H, W = 2, 8, 8, 8, 16, 16

    x = jax.random.normal(keys[0], (N, F_l, H, W), jnp.float32)
    g = jax.random.normal(keys[1], (N, F_g, H, W), jnp.float32)

    # PyTorch-layout parameters (Conv2d weight (Cout, Cin, 1, 1) squeezed).
    params = dict(
        wg=0.1 * jax.random.normal(keys[2], (F_int, F_g), jnp.float32),
        bg=0.1 * jax.random.normal(keys[3], (F_int,), jnp.float32),
        wx=0.1 * jax.random.normal(keys[4], (F_int, F_l), jnp.float32),
        bx=0.1 * jax.random.normal(keys[5], (F_int,), jnp.float32),
        wpsi=0.1 * jax.random.normal(keys[6], (F_int,), jnp.float32),
        bpsi=0.1 * jax.random.normal(keys[7], (), jnp.float32),
    )

    # Test 1: small shapes -> auto path picks the fused whole-HW kernel.
    out = attention_block(x, g, params)
    jax.block_until_ready(out)
    ref = attention_block_ref(x, g, params)
    assert out.shape == (N, F_l, H, W)
    assert jnp.allclose(out, ref, atol=1e-4, rtol=1e-4), "fused path mismatch"

    # Test 2: force the merged single-call tiled path (HW=1024, 4 tiles of 256).
    H2 = W2 = 32
    x2 = jax.random.normal(keys[8], (N, F_l, H2, W2), jnp.float32)
    g2 = jax.random.normal(keys[9], (N, F_g, H2, W2), jnp.float32)
    out2 = attention_block(x2, g2, params, tile_hw=256)
    jax.block_until_ready(out2)
    ref2 = attention_block_ref(x2, g2, params)
    assert jnp.allclose(out2, ref2, atol=1e-4, rtol=1e-4), "tiled path mismatch"

    print("KERNEL_OK")
</pallas_src>

<mosaic_0001>
module attributes {stable_mosaic.version = 11 : i64} {
  func.func @_fused_kernel(%arg0: i32, %arg1: memref<1x8x256xf32, #tpu.memory_space<vmem>>, %arg2: memref<1x8x256xf32, #tpu.memory_space<vmem>>, %arg3: memref<8x8xf32, #tpu.memory_space<vmem>>, %arg4: memref<8x8xf32, #tpu.memory_space<vmem>>, %arg5: memref<8x1xf32, #tpu.memory_space<vmem>>, %arg6: memref<1x1xf32, #tpu.memory_space<vmem>>, %arg7: memref<1x8x256xf32, #tpu.memory_space<vmem>>) attributes {dimension_semantics = [#tpu.dimension_semantics<parallel>], iteration_bounds = array<i64: 2>, scalar_prefetch = 0 : i64, scratch_operands = 0 : i64, tpu.core_type = #tpu.core_type<tc>, window_params = [{transform_indices = @transform_0, window_bounds = array<i64: 1, 8, 256>}, {transform_indices = @transform_1, window_bounds = array<i64: 1, 8, 256>}, {pipeline_mode = #tpu.pipeline_mode<synchronous>, transform_indices = @transform_2, window_bounds = array<i64: 8, 8>}, {pipeline_mode = #tpu.pipeline_mode<synchronous>, transform_indices = @transform_3, window_bounds = array<i64: 8, 8>}, {pipeline_mode = #tpu.pipeline_mode<synchronous>, transform_indices = @transform_4, window_bounds = array<i64: 8, 1>}, {pipeline_mode = #tpu.pipeline_mode<synchronous>, transform_indices = @transform_5, window_bounds = array<i64: 1, 1>}, {transform_indices = @transform_6, window_bounds = array<i64: 1, 8, 256>}]} {
    %c0 = arith.constant 0 : index
    %c0_0 = arith.constant 0 : index
    %0 = vector.load %arg3[%c0, %c0_0] : memref<8x8xf32, #tpu.memory_space<vmem>>, vector<8x8xf32>
    %c0_1 = arith.constant 0 : index
    %c0_2 = arith.constant 0 : index
    %c0_3 = arith.constant 0 : index
    %1 = vector.load %arg2[%c0_1, %c0_2, %c0_3] : memref<1x8x256xf32, #tpu.memory_space<vmem>>, vector<1x8x256xf32>
    %2 = vector.shape_cast %1 : vector<1x8x256xf32> to vector<8x256xf32>
    %cst = arith.constant dense<0.000000e+00> : vector<8x256xf32>
    %3 = tpu.matmul %0, %2, %cst {dimension_numbers = #tpu.dot_dimension_numbers<[1], [0], [0], [1], [0, 0, 1, 1], [], []>} : vector<8x8xf32>, vector<8x256xf32>, vector<8x256xf32> -> vector<8x256xf32>
    %c0_4 = arith.constant 0 : index
    %c0_5 = arith.constant 0 : index
    %4 = vector.load %arg4[%c0_4, %c0_5] : memref<8x8xf32, #tpu.memory_space<vmem>>, vector<8x8xf32>
    %c0_6 = arith.constant 0 : index
    %c0_7 = arith.constant 0 : index
    %c0_8 = arith.constant 0 : index
    %5 = vector.load %arg1[%c0_6, %c0_7, %c0_8] : memref<1x8x256xf32, #tpu.memory_space<vmem>>, vector<1x8x256xf32>
    %6 = vector.shape_cast %5 : vector<1x8x256xf32> to vector<8x256xf32>
    %cst_9 = arith.constant dense<0.000000e+00> : vector<8x256xf32>
    %7 = tpu.matmul %4, %6, %cst_9 {dimension_numbers = #tpu.dot_dimension_numbers<[1], [0], [0], [1], [0, 0, 1, 1], [], []>} : vector<8x8xf32>, vector<8x256xf32>, vector<8x256xf32> -> vector<8x256xf32>
    %cst_10 = arith.constant dense<0.000000e+00> : vector<8xf32>
    %8 = vector.multi_reduction <add>, %3, %cst_10 [1] : vector<8x256xf32> to vector<8xf32>
    %9 = vector.shape_cast %8 : vector<8xf32> to vector<8x1xf32>
    %cst_11 = arith.constant 2.560000e+02 : f32
    %10 = vector.broadcast %cst_11 : f32 to vector<8x1xf32>
    %11 = arith.divf %9, %10 : vector<8x1xf32>
    %12 = vector.broadcast %11 : vector<8x1xf32> to vector<8x256xf32>
    %13 = arith.subf %3, %12 : vector<8x256xf32>
    %14 = arith.mulf %13, %13 : vector<8x256xf32>
    %cst_12 = arith.constant dense<0.000000e+00> : vector<8xf32>
    %15 = vector.multi_reduction <add>, %14, %cst_12 [1] : vector<8x256xf32> to vector<8xf32>
    %16 = vector.shape_cast %15 : vector<8xf32> to vector<8x1xf32>
    %cst_13 = arith.constant 2.560000e+02 : f32
    %17 = vector.broadcast %cst_13 : f32 to vector<8x1xf32>
    %18 = arith.divf %16, %17 : vector<8x1xf32>
    %cst_14 = arith.constant 9.99999974E-6 : f32
    %19 = vector.broadcast %cst_14 : f32 to vector<8x1xf32>
    %20 = arith.addf %18, %19 : vector<8x1xf32>
    %21 = math.rsqrt %20 : vector<8x1xf32>
    %22 = vector.broadcast %21 : vector<8x1xf32> to vector<8x256xf32>
    %23 = arith.mulf %13, %22 : vector<8x256xf32>
    %cst_15 = arith.constant dense<0.000000e+00> : vector<8xf32>
    %24 = vector.multi_reduction <add>, %7, %cst_15 [1] : vector<8x256xf32> to vector<8xf32>
    %25 = vector.shape_cast %24 : vector<8xf32> to vector<8x1xf32>
    %cst_16 = arith.constant 2.560000e+02 : f32
    %26 = vector.broadcast %cst_16 : f32 to vector<8x1xf32>
    %27 = arith.divf %25, %26 : vector<8x1xf32>
    %28 = vector.broadcast %27 : vector<8x1xf32> to vector<8x256xf32>
    %29 = arith.subf %7, %28 : vector<8x256xf32>
    %30 = arith.mulf %29, %29 : vector<8x256xf32>
    %cst_17 = arith.constant dense<0.000000e+00> : vector<8xf32>
    %31 = vector.multi_reduction <add>, %30, %cst_17 [1] : vector<8x256xf32> to vector<8xf32>
    %32 = vector.shape_cast %31 : vector<8xf32> to vector<8x1xf32>
    %cst_18 = arith.constant 2.560000e+02 : f32
    %33 = vector.broadcast %cst_18 : f32 to vector<8x1xf32>
    %34 = arith.divf %32, %33 : vector<8x1xf32>
    %cst_19 = arith.constant 9.99999974E-6 : f32
    %35 = vector.broadcast %cst_19 : f32 to vector<8x1xf32>
    %36 = arith.addf %34, %35 : vector<8x1xf32>
    %37 = math.rsqrt %36 : vector<8x1xf32>
    %38 = vector.broadcast %37 : vector<8x1xf32> to vector<8x256xf32>
    %39 = arith.mulf %29, %38 : vector<8x256xf32>
    %40 = arith.addf %23, %39 : vector<8x256xf32>
    %cst_20 = arith.constant 0.000000e+00 : f32
    %41 = vector.broadcast %cst_20 : f32 to vector<8x256xf32>
    %42 = arith.maximumf %40, %41 : vector<8x256xf32>
    %c0_21 = arith.constant 0 : index
    %c0_22 = arith.constant 0 : index
    %43 = vector.load %arg5[%c0_21, %c0_22] : memref<8x1xf32, #tpu.memory_space<vmem>>, vector<8x1xf32>
    %44 = vector.broadcast %43 : vector<8x1xf32> to vector<8x256xf32>
    %45 = arith.mulf %42, %44 : vector<8x256xf32>
    %cst_23 = arith.constant dense<0.000000e+00> : vector<256xf32>
    %46 = vector.multi_reduction <add>, %45, %cst_23 [0] : vector<8x256xf32> to vector<256xf32>
    %47 = vector.shape_cast %46 : vector<256xf32> to vector<1x256xf32>
    %c0_24 = arith.constant 0 : index
    %c0_25 = arith.constant 0 : index
    %48 = vector.load %arg6[%c0_24, %c0_25] : memref<1x1xf32, #tpu.memory_space<vmem>>, vector<1x1xf32>
    %49 = vector.broadcast %48 : vector<1x1xf32> to vector<1x256xf32>
    %50 = arith.addf %47, %49 : vector<1x256xf32>
    %51 = arith.negf %50 : vector<1x256xf32>
    %52 = math.exp %51 : vector<1x256xf32>
    %cst_26 = arith.constant 1.000000e+00 : f32
    %53 = vector.broadcast %cst_26 : f32 to vector<1x256xf32>
    %54 = arith.addf %53, %52 : vector<1x256xf32>
    %55 = arith.divf %53, %54 : vector<1x256xf32>
    %c0_27 = arith.constant 0 : index
    %c0_28 = arith.constant 0 : index
    %c0_29 = arith.constant 0 : index
    %56 = vector.load %arg1[%c0_27, %c0_28, %c0_29] : memref<1x8x256xf32, #tpu.memory_space<vmem>>, vector<1x8x256xf32>
    %57 = vector.shape_cast %56 : vector<1x8x256xf32> to vector<8x256xf32>
    %58 = vector.broadcast %55 : vector<1x256xf32> to vector<8x256xf32>
    %59 = arith.mulf %57, %58 : vector<8x256xf32>
    %c0_30 = arith.constant 0 : index
    %c0_31 = arith.constant 0 : index
    %c0_32 = arith.constant 0 : index
    %60 = vector.load %arg7[%c0_30, %c0_31, %c0_32] : memref<1x8x256xf32, #tpu.memory_space<vmem>>, vector<1x8x256xf32>
    %61 = vector.shape_cast %60 : vector<1x8x256xf32> to vector<8x256xf32>
    %62 = vector.shape_cast %59 : vector<8x256xf32> to vector<1x8x256xf32>
    tpu.vector_store %arg7[%c0_30, %c0_31, %c0_32], %62 {strides = array<i32>} : memref<1x8x256xf32, #tpu.memory_space<vmem>>, vector<1x8x256xf32>,
    return
  }
  func.func @transform_0(%arg0: i32) -> (i32, i32, i32) {
    %c0_i32 = arith.constant 0 : i32
    %c0_i32_0 = arith.constant 0 : i32
    %c0_i32_1 = arith.constant 0 : i32
    return %arg0, %c0_i32, %c0_i32_0 : i32, i32, i32
  }
  func.func @transform_1(%arg0: i32) -> (i32, i32, i32) {
    %c0_i32 = arith.constant 0 : i32
    %c0_i32_0 = arith.constant 0 : i32
    %c0_i32_1 = arith.constant 0 : i32
    return %arg0, %c0_i32, %c0_i32_0 : i32, i32, i32
  }
  func.func @transform_2(%arg0: i32) -> (i32, i32) {
    %c0_i32 = arith.constant 0 : i32
    %c0_i32_0 = arith.constant 0 : i32
    %c0_i32_1 = arith.constant 0 : i32
    return %c0_i32, %c0_i32_0 : i32, i32
  }
  func.func @transform_3(%arg0: i32) -> (i32, i32) {
    %c0_i32 = arith.constant 0 : i32
    %c0_i32_0 = arith.constant 0 : i32
    %c0_i32_1 = arith.constant 0 : i32
    return %c0_i32, %c0_i32_0 : i32, i32
  }
  func.func @transform_4(%arg0: i32) -> (i32, i32) {
    %c0_i32 = arith.constant 0 : i32
    %c0_i32_0 = arith.constant 0 : i32
    %c0_i32_1 = arith.constant 0 : i32
    return %c0_i32, %c0_i32_0 : i32, i32
  }
  func.func @transform_5(%arg0: i32) -> (i32, i32) {
    %c0_i32 = arith.constant 0 : i32
    %c0_i32_0 = arith.constant 0 : i32
    %c0_i32_1 = arith.constant 0 : i32
    return %c0_i32, %c0_i32_0 : i32, i32
  }
  func.func @transform_6(%arg0: i32) -> (i32, i32, i32) {
    %c0_i32 = arith.constant 0 : i32
    %c0_i32_0 = arith.constant 0 : i32
    %c0_i32_1 = arith.constant 0 : i32
    return %arg0, %c0_i32, %c0_i32_0 : i32, i32, i32
  }
}

</mosaic_0001>

<bundles_post_ra>
// kernel: tpu_custom_call.1
= control target key start
LH: loop header
LB: loop body
LE: loop exit
PB: predicated region body
PF: predicated region fallthrough
CT: control target
= control target key end

     0   :  { %s1168_s0 = inlined_call_operand.hbm [shape: f32[2,8,256], index: 0, kind: input, shape index: {}]   ;;  %s1169_s1 = inlined_call_operand.hbm [shape: f32[2,8,256], index: 1, kind: input, shape index: {}]   ;;  %s1170_s2 = inlined_call_operand.vmem [shape: f32[8,8], index: 2, kind: input, shape index: {}]   ;;  %s1171_s3 = inlined_call_operand.hbm [shape: f32[8,8], index: 3, kind: input, shape index: {}]   ;;  %s1172_s4 = inlined_call_operand.vmem [shape: f32[8,1], index: 4, kind: input, shape index: {}]   ;;  %s1173_s5 = inlined_call_operand.<no memory space> [shape: f32[1,1], index: 5, kind: input, shape index: {}]   ;;  %s1174_s6 = inlined_call_operand.hbm [shape: f32[2,8,256], index: 6, kind: output, shape index: {}]  }
   0x1   :  { %1178 = sst [smem:[#allocation17_spill]] %s1171_s3  ;;  %v11_v0 = vstv %s1173_s5 }
   0x2   :  { %12 = vst [vmem:[#allocation2] sm:$0x1] %v11_v0 }
   0x3   :  { %13 = vsyncpa [#allocation4], 0 }
   0x4   :  { %15 = vsyncpa [#allocation4 + $0x1], 0 }
   0x5   :  { %16 = vsyncpa [#allocation7], 0 }
   0x6   :  { %18 = vsyncpa [#allocation7 + $0x1], 0 }
   0x7   :  { %19 = vsyncpa [#allocation5], 0 }
   0x8   :  { %21 = vsyncpa [#allocation5 + $0x1], 0  ;;  %s986_s23 = smov 0   ;;  %s988_s24 = smov 0  }
   0x9   :  { %s990_s25 = smov 0   ;;  %s992_s26 = smov 0  }
   0xa LB: > { %1179 = sst [smem:[#allocation14_spill]] %s939_s25  ;;  %s1007_s5 = sadd.s32 4294967295, %s943_s26   ;;  %s943_s26 = sphi %s992_s26, %s1189_s26   ;;  %s939_s25 = sphi %s990_s25, %s1191_s25   ;;  %s935_s24 = sphi %s988_s24, %s1193_s24   ;;  %s931_s23 = sphi %s986_s23, %s1192_s23  }
   0xb   : > { %s670_s27 = sadd.s32 4294967294, %s943_s26   ;;  %p47_p0 = scmp.ne.s32.totalorder %s935_s24, %s931_s23 }
   0xc   : > { %p48_p1 = scmp.eq.s32.totalorder %s1007_s5, 0  ;;  %p181_p2 = scmp.eq.s32.totalorder %s1007_s5, 1 }
   0xd   : > { %p187_p3 = scmp.eq.s32.totalorder %s670_s27, 1  ;;  %p671_p5 = scmp.ge.s32.totalorder %s943_s26, 1 }
   0xe   : > { %p1016_p4 = por %p48_p1, %p47_p0  ;;  %p194_p7 = scmp.lt.s32.totalorder %s943_s26, 3 }
   0xf   : > { %p1021_p6 = por %p187_p3, %p47_p0  ;;  %s1182_s3 = sld [smem:[#allocation17_spill]] }
  0x10   : > { %p1029_p8 = pnand %p671_p5, %p194_p7  ;;  %s945_s10 = smov [#allocation8]  }
  0x11   : > { %s211_s11 = sshll.u32 %s945_s10, 4  ;;  %s1039_s12 = sadd.s32 1, %s943_s26   ;;  %s212_s11 = int_to_ptr.vmem [resolvable:$true] %s211_s11 }
  0x12   : > { %p709_p10 = pneg %p1029_p8  ;;  %1184 = sst [smem:[#allocation15_spill]] %s1039_s12 }
  0x13   : > { %s34_s13 = sadd.s32 1, %s939_s25  ;;  %s31_s14 = ssub.s32 %s943_s26, %s1039_s12 }
  0x14   : > { %p710_p11 = pnand %p709_p10, %p48_p1  ;;  %p32_p12 = scmp.eq.s32.totalorder %s31_s14, 0 }
  0x15   : > { %s209_s8 = sshll.u32 %s1182_s3, 4  ;;  %p41_p13 = scmp.ne.s32.totalorder %s939_s25, %s935_s24  ;;  %s210_s8 = int_to_ptr.hbm [resolvable:$true] %s209_s8 }
  0x16   : > { %712 = dma.hbm_to_vmem [thread:$0]  (!%p710_p11), %s210_s8, 128, %s212_s11, [#allocation7]  }
  0x17   : > { %p42_p0 = scmp.eq.s32.totalorder %s943_s26, 0  ;;  %p725_p3 = scmp.lt.s32.totalorder %s943_s26, 2 }
  0x18   : > { %s1049_s15 = scalar_select %p32_p12, %s939_s25, %s34_s13  }
  0x19   : > { %p43_p5 = por %p42_p0, %p41_p13  ;;  %p1053_p7 = por %p181_p2, %p41_p13 }
  0x1a   : > { %1185 = sst [smem:[#allocation16_spill]] %s1049_s15  ;;  %s228_s17 = sand.u32 1, %s939_s25  }
  0x1b   : > { %s696_s18 = sshll.u32 %s943_s26, 4  ;;  %s674_s19 = sshll.u32 %s228_s17, 4 }
  0x1c   : > { %s237_s22 = scalar_lea.hbm %s1168_s0, %s696_s18  ;;  %s232_s30 = scalar_lea.vmem [#allocation3], %s674_s19 }
  0x1d   : > { %s239_s27 = sshll.u32 %s237_s22, 4  ;;  %s241_s7 = sshll.u32 %s232_s30, 4  ;;  %s240_s27 = int_to_ptr.hbm [resolvable:$true] %s239_s27  ;;  %s242_s7 = int_to_ptr.vmem [resolvable:$true] %s241_s7 }
  0x1e   : > { %p1064_p10 = pnand %p725_p3, %p43_p5  ;;  %s257_s13 = scalar_lea.hbm %s1169_s1, %s696_s18 }
  0x1f   : > { %s248_s14 = sand.u32 1, %s943_s26   ;;  %s229_s3 = scalar_lea.sflag [#allocation4], %s228_s17 }
  0x20   : > { %s809_s20 = sshra.s32 %s240_s27, 4  ;;  %p813_p11 = pneg %p1064_p10  ;;  %s810_s20 = int_to_ptr.hbm [resolvable:$true] %s809_s20 }
  0x21   : > { %s811_s21 = scalar_lea.hbm %s810_s20, 16  ;;  %s816_s15 = scalar_lea.hbm %s1168_s0, 32 }
  0x22   : > { %p812_p2 = scmp.ne.s32.totalorder %s810_s20, %s811_s21  ;;  %p817_p0 = scmp.lt.s32.totalorder %s810_s20, %s1168_s0 }
  0x23   : > { %p818_p3 = scmp.lt.s32.totalorder %s816_s15, %s811_s21 }
  0x24   : > { %p814_p12 = pnand %p813_p11, %p812_p2 }
  0x25   : > { %p819_p5 = por %p818_p3, %p817_p0 }
  0x26   : > { %p815_p13 = pneg %p814_p12 }
  0x28   : > { %p820_p9 = pnand %p819_p5, %p815_p13 }
  0x2a   : > { %823 = shalt.err (!%p820_p9)
}
  0x2b   : > { %716 = dma.hbm_to_vmem [thread:$0]  (!%p1064_p10), %s240_s27, 256, %s242_s7, %s229_s3  }
  0x2c   : > { %s259_s17 = sshll.u32 %s257_s13, 4  ;;  %s252_s18 = scalar_lea.vmem [#allocation6], %s674_s19  ;;  %s260_s17 = int_to_ptr.hbm [resolvable:$true] %s259_s17 }
  0x2d   : > { %s261_s25 = sshll.u32 %s252_s18, 4  ;;  %s249_s12 = scalar_lea.sflag [#allocation7], %s248_s14  ;;  %s262_s25 = int_to_ptr.vmem [resolvable:$true] %s261_s25 }
  0x2e   : > { %s839_s22 = sshra.s32 %s260_s17, 4  ;;  %s846_s21 = scalar_lea.hbm %s1169_s1, 32  ;;  %s840_s22 = int_to_ptr.hbm [resolvable:$true] %s839_s22 }
  0x2f   : > { %s841_s30 = scalar_lea.hbm %s840_s22, 16  ;;  %p847_p9 = scmp.lt.s32.totalorder %s840_s22, %s1169_s1 }
  0x30   : > { %p842_p2 = scmp.ne.s32.totalorder %s840_s22, %s841_s30  ;;  %p848_p13 = scmp.lt.s32.totalorder %s846_s21, %s841_s30 }
  0x32   : > { %p844_p12 = pnand %p842_p2, %p813_p11  ;;  %p849_p3 = por %p848_p13, %p847_p9 }
  0x34   : > { %p845_p0 = pneg %p844_p12 }
  0x36   : > { %p850_p5 = pnand %p849_p3, %p845_p0 }
  0x38   : > { %853 = shalt.err (!%p850_p5)
}
  0x39   : > { %719 = dma.hbm_to_vmem [thread:$0]  (!%p1064_p10), %s260_s17, 256, %s262_s25, %s249_s12  }
  0x3a   : > { %270 = sbr.rel (%p1029_p8) target bundleno = 525 (0x20d), region = 44  ;;  %s1099_s19 = sand.u32 (!%p1029_p8), 1, %s935_s24  }
  0x3b   : > { %s1102_s27 = sshll.u32 (!%p1029_p8), %s1099_s19, 4  ;;  %s273_s7 = scalar_lea.sflag (!%p1029_p8), [#allocation4], %s1099_s19 }
  0x3c   : > { %s276_s13 = scalar_lea.vmem (!%p1029_p8), [#allocation3], %s1102_s27 }
  0x3f   : > { %914 = dma.done.wait (%p1016_p4), %s273_s7, 256  }
  0x40   : > { %916 = vsyncadd (%p1016_p4), %s273_s7, 4294967040  ;;  %s282_s25 = sand.u32 1, %s1007_s5   ;;  %s286_s12 = scalar_lea.vmem [#allocation6], %s1102_s27 }
  0x41   : > { %s283_s9 = scalar_lea.sflag [#allocation7], %s282_s25 }
  0x42   : > { %918 = dma.done.wait (%p1016_p4), %s283_s9, 256  }
  0x43   : > { %920 = vsyncadd (%p1016_p4), %s283_s9, 4294967040 }
  0x44   : > { %922 = dma.done.wait (%p48_p1), [#allocation7], 128  }
  0x45   : > { %924 = vsyncadd (%p48_p1), [#allocation7], 4294967168  ;;  %vm329_vm0 = vcmask 64512   ;;  %v327_v1 = vld [vmem:[%s286_s12] sm:$0xff]  ;;  %v328_v2 = vld [vmem:[%s286_s12 + $0x8] sm:$0xff]  ;;  %v946_v13 = vmov 256.0  }
  0x46   : > { %v326_v3 = vld [vmem:[%s1170_s2] sm:$0xff]  ;;  %348 = vmatpush.msra.mxu0 %v327_v1  ;;  %368 = vmatpush.msra.mxu1 %v328_v2  ;;  %765 = vrcp.f32 %v946_v13  ;;  %v947_v18 = vmov 0   ;;  %s698_s17 = sshll.u32 %s1007_s5, 4  ;;  %s325_s5 = scalar_lea.vmem [#allocation9], %s1102_s27 }
  0x47   : > { %v1123_v4 = vld [vmem:[%s276_s13] sm:$0xff]  ;;  %v1125_v5 = vld [vmem:[%s276_s13 + $0x8] sm:$0xff]  ;;  %685 = vmatmul.msk.f32.vlgmr.msra.gmra.mxu0 %vm329_vm0, %v326_v3  ;;  %686 = vmatmul.msk.f32.vlgmr.msra.gmra.mxu1 %vm329_vm0, %v326_v3  ;;  %s563_s30 = scalar_lea.hbm %s1174_s6, %s698_s17  ;;  %s565_s15 = sshll.u32 %s325_s5, 4  ;;  %s566_s15 = int_to_ptr.vmem [resolvable:$true] %s565_s15 }
  0x48   : > { %v373_v6 = vld [vmem:[#allocation8] sm:$0xff]  ;;  %394 = vmatpush.msra.mxu2 %v1123_v4  ;;  %414 = vmatpush.msra.mxu3 %v1125_v5  ;;  %v500_v20 = vld [vmem:[#allocation2] sm:$0x1]  ;;  %s567_s20 = sshll.u32 %s563_s30, 4  ;;  %s552_s21 = scalar_lea.sflag [#allocation5], %s1099_s19  ;;  %s568_s20 = int_to_ptr.hbm [resolvable:$true] %s567_s20 }
  0x49   : > { %687 = vmatmul.msk.f32.vlgmr.msra.gmra.mxu2 %vm329_vm0, %v373_v6  ;;  %688 = vmatmul.msk.f32.vlgmr.msra.gmra.mxu3 %vm329_vm0, %v373_v6  ;;  %v480_v16 = vld [vmem:[%s1172_s4] sm:$0xff]  ;;  %s883_s10 = sshra.s32 %s568_s20, 4  ;;  %s889_s13 = scalar_lea.hbm %s1174_s6, 32  ;;  %s884_s10 = int_to_ptr.hbm [resolvable:$true] %s883_s10 }
  0x4a   : > { %763 = vset.pattern.permute.xlu2 %v947_v18  ;;  %764 = vset.pattern.permute.xlu0 %v947_v18  ;;  %s885_s3 = scalar_lea.hbm %s884_s10, 16  ;;  %p890_p10 = scmp.lt.s32.totalorder %s884_s10, %s1174_s6 }
  0x4b   : > { %483 = vperm.xlu2 %763, %v480_v16   ;;  %p886_p1 = scmp.ne.s32.totalorder %s884_s10, %s885_s3  ;;  %p891_p11 = scmp.lt.s32.totalorder %s889_s13, %s885_s3 }
  0x4c   : > { %v766_v14 = vpop.eup %765 }
  0x4d   : > { %v423_v15 = vmul.f32 256.0, %v766_v14  ;;  %vm427_vm1 = vweird.f32 %v766_v14  ;;  %p887_p4 = pnand %p886_p1, %p1053_p7  ;;  %p892_p2 = por %p891_p11, %p890_p10 }
  0x4f   : > { %v424_v17 = vsub.f32 1.0, %v423_v15  ;;  %p888_p8 = pneg %p887_p4 }
  0x51   : > { %v425_v19 = vmul.f32 %v766_v14, %v424_v17  ;;  %p893_p12 = pnand %p892_p2, %p888_p8 }
  0x53   : > { %v426_v21 = vadd.f32 %v766_v14, %v425_v19  ;;  %503 = vperm.xlu2 %763, %v500_v20  }
  0x55   : > { %v428_v22 = vsel %vm427_vm1, %v766_v14, %v426_v21 }
  0xa5   : > { %v484_v1 = vpop.permute.xlu2 %483 }
  0xad   : > { %v504_v14 = vpop.permute.xlu2 %503 }
  0xae   : > { %v506_v19 = vperm.slane %v504_v14, 0 }
  0xc4   : > { %v350_v7 = vpop.f32.mrf.mxu0  ;;  %v370_v8 = vpop.f32.mrf.mxu1 }
  0xc5   : > { %v419_v9 = vadd.f32 %v370_v8, %v350_v7 }
  0xc7   : > { %420 = vadd.xlane.f32.xlu0 %v419_v9 }
  0xcc   : > { %v396_v10 = vpop.f32.mrf.mxu2  ;;  %v416_v11 = vpop.f32.mrf.mxu3 }
  0xcd   : > { %v451_v12 = vadd.f32 %v416_v11, %v396_v10 }
  0xcf   : > { %452 = vadd.xlane.f32.xlu0 %v451_v12 }
 0x13a   : > { %v421_v23 = vpop.xlane.xlu0 %420 }
 0x13b   : > { %v429_v24 = vmul.f32 %v428_v22, %v421_v23 }
 0x13d   : > { %v430_v25 = vsub.f32 %v350_v7, %v429_v24  ;;  %v431_v26 = vsub.f32 %v370_v8, %v429_v24 }
 0x13f   : > { %v432_v27 = vmul.f32 %v430_v25, %v430_v25  ;;  %v433_v28 = vmul.f32 %v431_v26, %v431_v26 }
 0x141   : > { %v434_v29 = vadd.f32 %v433_v28, %v432_v27 }
 0x142   : > { %v453_v30 = vpop.xlane.xlu0 %452 }
 0x143   : > { %v454_v31 = vmul.f32 %v453_v30, %v428_v22  ;;  %435 = vadd.xlane.f32.xlu1 %v434_v29 }
 0x145   : > { %v455_v32 = vsub.f32 %v396_v10, %v454_v31  ;;  %v456_v33 = vsub.f32 %v416_v11, %v454_v31 }
 0x147   : > { %v457_v34 = vmul.f32 %v455_v32, %v455_v32  ;;  %v458_v35 = vmul.f32 %v456_v33, %v456_v33 }
 0x149   : > { %v459_v36 = vadd.f32 %v458_v35, %v457_v34 }
 0x14b   : > { %460 = vadd.xlane.f32.xlu1 %v459_v36 }
 0x1b6   : > { %v436_v37 = vpop.xlane.xlu1 %435 }
 0x1b7   : > { %v437_v38 = vmul.f32 %v436_v37, %v428_v22 }
 0x1b9   : > { %v438_v39 = vadd.f32 1e-05, %v437_v38 }
 0x1bb   : > { %767 = vrsqrt.f32 %v438_v39  ;;  %vm445_vm3 = vweird.f32 %v438_v39 }
 0x1be   : > { %v461_v40 = vpop.xlane.xlu1 %460 }
 0x1bf   : > { %v462_v41 = vmul.f32 %v461_v40, %v428_v22 }
 0x1c1   : > { %v768_v42 = vpop.eup %767  ;;  %v463_v43 = vadd.f32 1e-05, %v462_v41 }
 0x1c2   : > { %v440_v44 = vmul.f32 %v768_v42, %v438_v39  ;;  %vm446_vm2 = vweird.f32 %v768_v42 }
 0x1c3   : > { %769 = vrsqrt.f32 %v463_v43  ;;  %vm447_vm5 = vmor %vm445_vm3, %vm446_vm2  ;;  %vm470_vm6 = vweird.f32 %v463_v43 }
 0x1c4   : > { %v441_v45 = vmul.f32 %v768_v42, %v440_v44 }
 0x1c6   : > { %v442_v46 = vmul.f32 0.5, %v441_v45 }
 0x1c8   : > { %v443_v48 = vsub.f32 1.5, %v442_v46 }
 0x1c9   : > { %v770_v47 = vpop.eup %769 }
 0x1ca   : > { %v465_v49 = vmul.f32 %v770_v47, %v463_v43  ;;  %v444_v51 = vmul.f32 %v768_v42, %v443_v48  ;;  %vm471_vm4 = vweird.f32 %v770_v47 }
 0x1cb   : > { %vm472_vm7 = vmor %vm470_vm6, %vm471_vm4 }
 0x1cc   : > { %v466_v50 = vmul.f32 %v770_v47, %v465_v49  ;;  %v448_v55 = vsel %vm447_vm5, %v768_v42, %v444_v51 }
 0x1cd   : > { %v449_v57 = vmul.f32 %v448_v55, %v430_v25  ;;  %v450_v58 = vmul.f32 %v448_v55, %v431_v26 }
 0x1ce   : > { %v467_v52 = vmul.f32 0.5, %v466_v50 }
 0x1d0   : > { %v468_v53 = vsub.f32 1.5, %v467_v52 }
 0x1d2   : > { %v469_v54 = vmul.f32 %v770_v47, %v468_v53 }
 0x1d4   : > { %v473_v56 = vsel %vm472_vm7, %v770_v47, %v469_v54 }
 0x1d5   : > { %v474_v59 = vmul.f32 %v473_v56, %v455_v32  ;;  %v475_v60 = vmul.f32 %v473_v56, %v456_v33 }
 0x1d7   : > { %v476_v61 = vadd.f32 %v474_v59, %v449_v57  ;;  %v477_v62 = vadd.f32 %v475_v60, %v450_v58 }
 0x1d9   : > { %v478_v63 = vmax.f32 %v476_v61, 0.0  ;;  %v479_v0 = vmax.f32 %v477_v62, 0.0 }
 0x1db   : > { %v486_v2 = vmul.f32 %v484_v1, %v478_v63  ;;  %v487_v3 = vmul.f32 %v484_v1, %v479_v0 }
 0x1dd   : > { %v488_v6 = vrot.slane %v486_v2, 4  ;;  %v494_v7 = vrot.slane %v487_v3, 4 }
 0x1df   : > { %v489_v8 = vadd.f32 %v488_v6, %v486_v2  ;;  %v495_v9 = vadd.f32 %v494_v7, %v487_v3 }
 0x1e1   : > { %v490_v10 = vrot.slane %v489_v8, 2  ;;  %v496_v11 = vrot.slane %v495_v9, 2 }
 0x1e3   : > { %v491_v12 = vadd.f32 %v490_v10, %v489_v8  ;;  %v497_v13 = vadd.f32 %v496_v11, %v495_v9 }
 0x1e5   : > { %v492_v15 = vrot.slane %v491_v12, 1  ;;  %v498_v16 = vrot.slane %v497_v13, 1 }
 0x1e7   : > { %v493_v17 = vadd.f32 %v492_v15, %v491_v12  ;;  %v499_v18 = vadd.f32 %v498_v16, %v497_v13 }
 0x1e9   : > { %v507_v20 = vadd.f32 %v506_v19, %v493_v17  ;;  %v508_v21 = vadd.f32 %v506_v19, %v499_v18 }
 0x1eb   : > { %v689_v22 = vmul.f32 -1.442695, %v507_v20  ;;  %v690_v23 = vmul.f32 -1.442695, %v508_v21 }
 0x1ed   : > { %771 = vpow2.f32 %v689_v22 }
 0x1ee   : > { %773 = vpow2.f32 %v690_v23 }
 0x1f3   : > { %v772_v24 = vpop.eup %771 }
 0x1f4   : > { %v774_v25 = vpop.eup %773  ;;  %v515_v26 = vadd.f32 1.0, %v772_v24 }
 0x1f5   : > { %v516_v27 = vadd.f32 1.0, %v774_v25 }
 0x1f6   : > { %775 = vrcp.f32 %v515_v26  ;;  %v528_v33 = vand.u32 2147483648, %v515_v26  ;;  %v526_v37 = vand.u32 2147483647, %v515_v26  ;;  %vm522_vm10 = vweird.f32 %v515_v26 }
 0x1f7   : > { %777 = vrcp.f32 %v516_v27  ;;  %v543_v36 = vand.u32 2147483648, %v516_v27  ;;  %v541_v39 = vand.u32 2147483647, %v516_v27  ;;  %vm537_vm12 = vweird.f32 %v516_v27 }
 0x1f8   : > { %v529_v41 = vor.u32 1.1754944e-38, %v528_v33  ;;  %vm527_vm14 = vcmp.eq.f32.partialorder %v526_v37, 8.507059e+37 }
 0x1f9   : > { %v544_v43 = vor.u32 1.1754944e-38, %v543_v36  ;;  %vm542_vm15 = vcmp.eq.f32.partialorder %v541_v39, 8.507059e+37 }
 0x1fc   : > { %v776_v28 = vpop.eup %775 }
 0x1fd   : > { %v778_v29 = vpop.eup %777  ;;  %v518_v30 = vmul.f32 %v776_v28, %v515_v26  ;;  %vm523_vm8 = vweird.f32 %v776_v28 }
 0x1fe   : > { %v533_v31 = vmul.f32 %v778_v29, %v516_v27  ;;  %vm538_vm9 = vweird.f32 %v778_v29  ;;  %vm524_vm11 = vmor %vm522_vm10, %vm523_vm8 }
 0x1ff   : > { %v519_v32 = vsub.f32 1.0, %v518_v30  ;;  %vm539_vm13 = vmor %vm537_vm12, %vm538_vm9 }
 0x200   : > { %v534_v34 = vsub.f32 1.0, %v533_v31 }
 0x201   : > { %v520_v35 = vmul.f32 %v776_v28, %v519_v32 }
 0x202   : > { %v535_v38 = vmul.f32 %v778_v29, %v534_v34 }
 0x203   : > { %v521_v40 = vadd.f32 %v776_v28, %v520_v35 }
 0x204   : > { %v536_v42 = vadd.f32 %v778_v29, %v535_v38 }
 0x205   : > { %v525_v44 = vsel %vm524_vm11, %v776_v28, %v521_v40 }
 0x206   : > { %v530_v45 = vsel %vm527_vm14, %v529_v41, %v525_v44  ;;  %v540_v46 = vsel %vm539_vm13, %v778_v29, %v536_v42 }
 0x207   : > { %v545_v47 = vsel %vm542_vm15, %v544_v43, %v540_v46  ;;  %v547_v48 = vmul.f32 %v530_v45, %v1123_v4 }
 0x208   : > { %v548_v49 = vmul.f32 %v545_v47, %v1125_v5 }
 0x209   : > { %549 = vst [vmem:[%s325_s5] sm:$0xff] %v547_v48 }
 0x20a   : > { %550 = vst [vmem:[%s325_s5 + $0x8] sm:$0xff] %v548_v49 }
 0x20b   : > { %896 = shalt.err (!%p893_p12)
}
 0x20c   : > { %707 = dma.vmem_to_hbm [thread:$0]  (%p1053_p7), %s566_s15, 256, %s568_s20, %s552_s21  }
 0x20d PF: > { %s579_s19 = sand.u32 1, %s931_s23   ;;  %p1188_p0 = scmp.ge.s32.totalorder %s943_s26, 2 }
 0x20e   : > { %s580_s12 = scalar_lea.sflag [#allocation5], %s579_s19 }
 0x20f   : > { %p721_p9 = pnand %p1188_p0, %p1021_p6 }
 0x211   : > { %p722_p13 = pneg %p721_p9 }
 0x213   : > { %926 = dma.done.wait (%p722_p13), %s580_s12, 256  }
 0x214   : > { %928 = vsyncadd (%p722_p13), %s580_s12, 4294967040  ;;  %s1189_s26 = sld [smem:[#allocation15_spill]]  ;;  %s1192_s23 = smov %s935_s24 }
 0x215   : > { %s1190_s8 = sld [smem:[#allocation14_spill]] }
 0x216   : > { %s1191_s25 = sld [smem:[#allocation16_spill]] }
 0x21a   : > { %p24_p3 = scmp.ge.s32.totalorder %s1189_s26, 4  }
 0x21b   : > { %s1193_s24 = smov %s1190_s8 }
 0x21c   :  { %26 = sbr.rel (!%p24_p3) target bundleno = 10 (0xa), region = 106 }
 0x221   :  { %586 = vsyncpa [#allocation4], 1 }
 0x222   :  { %588 = vsyncpa [#allocation4 + $0x1], 1 }
 0x223   :  { %589 = vsyncpa [#allocation7], 1 }
 0x224   :  { %591 = vsyncpa [#allocation7 + $0x1], 1 }
 0x225   :  { %592 = vsyncpa [#allocation5], 1 }
 0x226   :  { %594 = vsyncpa [#allocation5 + $0x1], 1 }

</bundles_post_ra>
